<compile_context>
chip_gen: v7x
topology: tpu7x:2x2x1
jax: 0.10.0
libtpu: 0.0.40
codegen_flags: <defaults>
</compile_context>

<pallas_src>
import numpy as np

import jax
import jax.numpy as jnp
from jax import lax
from jax.experimental import pallas as pl
from jax.experimental.pallas import tpu as pltpu


# ---------------------------------------------------------------------------
# small helpers
# ---------------------------------------------------------------------------
def _interp_matrix(out_size, in_size):
    """1-D bilinear (align_corners=True) interpolation matrix (out_size, in_size)."""
    if in_size == 1:                     # guard: constant along this axis
        return jnp.ones((out_size, 1), jnp.float32)
    if out_size == 1:                    # guard: sample the first element
        return jax.nn.one_hot(jnp.zeros((1,), jnp.int32), in_size, dtype=jnp.float32)
    src = jnp.arange(out_size, dtype=jnp.float32) * (in_size - 1) / (out_size - 1)
    i0 = jnp.clip(jnp.floor(src).astype(jnp.int32), 0, in_size - 2)
    frac = src - i0.astype(jnp.float32)
    oh0 = jax.nn.one_hot(i0, in_size, dtype=jnp.float32)
    oh1 = jax.nn.one_hot(i0 + 1, in_size, dtype=jnp.float32)
    return oh0 * (1.0 - frac)[:, None] + oh1 * frac[:, None]


def _fold_bn(gamma, beta, mean, var, eps=1e-5):
    scale = gamma / jnp.sqrt(var + eps)
    bias = beta - mean * scale
    return scale, bias


def _toeplitz_rhs(w_hwio, W):
    """Per-dy RHS for a stride-1 SAME conv in packed-lane layout.

    Width zero-padding is implicit (out-of-range taps are dropped), so the RHS maps a
    packed input row of length W*Cin to a packed output row of length W*Cout exactly —
    no wasted lanes.  Result shape: (K, W*Cin, W*Cout), f32.
    """
    K, _, Cin, Cout = w_hwio.shape
    pad = (K - 1) // 2
    sel = np.zeros((K, W, W), np.float32)
    for dx in range(K):
        for wout in range(W):
            win = wout + dx - pad
            if 0 <= win < W:
                sel[dx, win, wout] = 1.0
    sel = jnp.asarray(sel)
    # t[dy, win, cin, wout, cout] = sum_dx sel[dx, win, wout] * w[dy, dx, cin, cout]
    t = jnp.einsum('axw,kacd->kxcwd', sel, w_hwio,
                   precision=lax.Precision.HIGHEST)
    return t.reshape(K, W * Cin, W * Cout)


def _pick_row_tile(H, N, cap=128):
    """Largest multiple-of-8 divisor of H (<= cap).  When N == 1, prefer >=2 tiles so
    both v7x TensorCores get work.  Falls back to full H."""
    if H % 8 != 0:
        return H
    divisors = [t for t in range(8, H + 1, 8) if H % t == 0]
    fitting = [t for t in divisors if t <= cap] or [divisors[0]]
    th = max(fitting)
    if N == 1 and th == H:
        smaller = [t for t in fitting if t < H]
        if smaller:
            th = max(smaller)
    return th


# ---------------------------------------------------------------------------
# fused Pallas kernel
#   conv1(3x3)+BN1+ReLU -> VMEM scratch (row halo, recomputed)
#   conv2(3x3)+BN2 + conv_up(KxK)+BN_up + add + ReLU -> output
# ---------------------------------------------------------------------------
def _make_fused_kernel(TH, THm, n_tiles, H, W, Cout, k_up, up_row_base):
    def kernel(x_ref, t1_ref, t2_ref, tu_ref, b1_ref, b2u_ref, out_ref, mid_ref):
        if n_tiles == 1:
            base = 0                                        # fully static slices
        else:
            base = pl.multiple_of(pl.program_id(1) * TH, 8)

        # --- conv1 + BN1 + ReLU into mid scratch -------------------------------
        # scratch row j corresponds to mid row m = base - 1 + j (j in [0, THm));
        # padded-input row for tap dy is base + j + dy  (input is row-padded by 2).
        acc1 = None
        for dy in range(3):
            rows = x_ref[0, pl.ds(base + dy, THm), :]       # (THm, W0*Cin) bf16
            part = jnp.dot(rows, t1_ref[dy], preferred_element_type=jnp.float32)
            acc1 = part if acc1 is None else acc1 + part
        mid = jnp.maximum(acc1 + b1_ref[...], 0.0)
        # conv2's row zero-padding: mid rows outside [0, H) must be exactly zero.
        m_row = base - 1 + lax.broadcasted_iota(jnp.int32, (THm, 1), 0)
        mid = jnp.where((m_row >= 0) & (m_row < H), mid, 0.0)
        mid_ref[...] = mid.astype(mid_ref.dtype)
        # acc1 / mid are dead here -> only one f32 accumulator live below.

        # --- conv2 + BN2 + residual (conv_up + BN_up) + ReLU, one accumulator --
        acc = None
        for dy in range(3):
            rows = mid_ref[pl.ds(dy, TH), :]                # (TH, W*Cout) bf16
            part = jnp.dot(rows, t2_ref[dy], preferred_element_type=jnp.float32)
            acc = part if acc is None else acc + part
        for dy in range(k_up):
            rows = x_ref[0, pl.ds(base + up_row_base + dy, TH), :]
            acc = acc + jnp.dot(rows, tu_ref[dy], preferred_element_type=jnp.float32)
        out_ref[0] = jnp.maximum(acc + b2u_ref[...], 0.0).astype(out_ref.dtype)

    return kernel


# ---------------------------------------------------------------------------
# module forward (NCHW in / NCHW out, matching the PyTorch reference)
# ---------------------------------------------------------------------------
def upsample_basic_block(x_nchw, params, scale=2):
    N, Cin, H0, W0 = x_nchw.shape
    w1, w2, wu = params['w1'], params['w2'], params['w_up']
    Cout = w1.shape[-1]
    k_up = wu.shape[0]
    H, W = H0 * scale, W0 * scale

    # -- fold BatchNorm (inference / running-stats form) into the conv weights --
    s1, b1 = _fold_bn(*params['bn1'])
    s2, b2 = _fold_bn(*params['bn2'])
    su, bu = _fold_bn(*params['bn_up'])

    # -- Toeplitz RHS with implicit zero width-padding; fold the bilinear width
    #    interpolation (Aw (x) I_Cin) into conv1 / conv_up so the kernel reads
    #    original-width packed rows (W0*Cin lanes) --
    aw = _interp_matrix(W, W0)                                        # (W, W0)
    A = jnp.kron(aw, jnp.eye(Cin, dtype=jnp.float32))                 # (W*Cin, W0*Cin)
    t1 = _toeplitz_rhs(w1 * s1, W)                                    # (3, W*Cin, W*Cout)
    tu = _toeplitz_rhs(wu * su, W)                                    # (k_up, W*Cin, W*Cout)
    t1 = jnp.einsum('ux,kuy->kxy', A, t1,
                    precision=lax.Precision.HIGHEST).astype(jnp.bfloat16)
    tu = jnp.einsum('ux,kuy->kxy', A, tu,
                    precision=lax.Precision.HIGHEST).astype(jnp.bfloat16)
    t2 = _toeplitz_rhs(w2 * s2, W).astype(jnp.bfloat16)               # (3, W*Cout, W*Cout)

    b1_row = jnp.tile(b1, W).reshape(1, W * Cout).astype(jnp.float32)
    b2u_row = jnp.tile(b2 + bu, W).reshape(1, W * Cout).astype(jnp.float32)

    # -- row tiling (dynamic-start in-kernel slices keep multiple-of-8 sizes) --
    TH = _pick_row_tile(H, N)
    n_tiles = H // TH
    THm = TH + 2 if n_tiles == 1 else TH + 8       # conv1 halo rows (>= TH + 2)
    pad_bottom = THm - TH
    Hp = H + 2 + pad_bottom
    pad_up = (k_up - 1) // 2
    up_row_base = 2 - pad_up                       # 2 for 1x1, 1 for 3x3 residual conv

    # -- height (row) upsample at original width, default precision, with the
    #    kernel's row zero-padding folded into the interpolation matrix --
    x = jnp.transpose(x_nchw, (0, 2, 3, 1)).astype(jnp.float32)       # NHWC
    ah = jnp.pad(_interp_matrix(H, H0), ((2, pad_bottom), (0, 0)))    # (Hp, H0)
    xh = jnp.einsum('ph,nhwc->npwc', ah, x)                           # (N, Hp, W0, Cin)
    xh = xh.reshape(N, Hp, W0 * Cin).astype(jnp.bfloat16)             # packed lanes

    # -- VMEM estimate: double-buffering of every pipelined block + scratch + headroom --
    in_bytes = Hp * W0 * Cin * 2
    const_bytes = (t1.size + t2.size + tu.size) * 2 + (b1_row.size + b2u_row.size) * 4
    out_bytes = TH * W * Cout * 4
    scratch_bytes = THm * W * Cout * 2
    est = 2 * (in_bytes + const_bytes + out_bytes) + scratch_bytes
    vmem_limit = int(min(56 << 20, max(24 << 20, est + (4 << 20))))

    out = pl.pallas_call(
        _make_fused_kernel(TH, THm, n_tiles, H, W, Cout, k_up, up_row_base),
        grid=(N, n_tiles),
        in_specs=[
            pl.BlockSpec((1, Hp, W0 * Cin), lambda n, i: (n, 0, 0)),
            pl.BlockSpec((3, W0 * Cin, W * Cout), lambda n, i: (0, 0, 0)),
            pl.BlockSpec((3, W * Cout, W * Cout), lambda n, i: (0, 0, 0)),
            pl.BlockSpec((k_up, W0 * Cin, W * Cout), lambda n, i: (0, 0, 0)),
            pl.BlockSpec((1, W * Cout), lambda n, i: (0, 0)),
            pl.BlockSpec((1, W * Cout), lambda n, i: (0, 0)),
        ],
        out_specs=pl.BlockSpec((1, TH, W * Cout), lambda n, i: (n, i, 0)),
        out_shape=jax.ShapeDtypeStruct((N, H, W * Cout), jnp.float32),
        scratch_shapes=[pltpu.VMEM((THm, W * Cout), jnp.bfloat16)],
        compiler_params=pltpu.CompilerParams(
            dimension_semantics=("parallel", "parallel"),
            vmem_limit_bytes=vmem_limit),
    )(xh, t1, t2, tu, b1_row, b2u_row)

    out = out.reshape(N, H, W, Cout)
    return jnp.transpose(out, (0, 3, 1, 2))                 # NHWC -> NCHW


# ---------------------------------------------------------------------------
# deterministic parameter init (shapes per the module's __init__)
# ---------------------------------------------------------------------------
def init_params(key, inplanes, planes):
    def conv_w(k, K, cin, cout):
        std = (2.0 / (K * K * cin)) ** 0.5
        return std * jax.random.normal(k, (K, K, cin, cout), jnp.float32)

    def bn_stats(k, c):
        k1, k2, k3, k4 = jax.random.split(k, 4)
        gamma = 1.0 + 0.1 * jax.random.normal(k1, (c,), jnp.float32)
        beta = 0.1 * jax.random.normal(k2, (c,), jnp.float32)
        mean = 0.1 * jax.random.normal(k3, (c,), jnp.float32)
        var = jnp.abs(1.0 + 0.1 * jax.random.normal(k4, (c,), jnp.float32))
        return (gamma, beta, mean, var)

    k = jax.random.split(key, 6)
    K_up = 1 if inplanes != planes else 3      # as in the PyTorch module
    return {
        'w1': conv_w(k[0], 3, inplanes, planes),
        'bn1': bn_stats(k[1], planes),
        'w2': conv_w(k[2], 3, planes, planes),
        'bn2': bn_stats(k[3], planes),
        'w_up': conv_w(k[4], K_up, inplanes, planes),
        'bn_up': bn_stats(k[5], planes),
    }


# ---------------------------------------------------------------------------
# pure-JAX reference (f32, HIGHEST precision) for a correctness sanity check
# ---------------------------------------------------------------------------
def ref_forward(x_nchw, params, scale=2):
    x = jnp.transpose(x_nchw, (0, 2, 3, 1)).astype(jnp.float32)
    N, H0, W0, Cin = x.shape
    ah = _interp_matrix(H0 * scale, H0)
    aw = _interp_matrix(W0 * scale, W0)
    xu = jnp.einsum('ph,nhwc->npwc', ah, x, precision=lax.Precision.HIGHEST)
    xu = jnp.einsum('qw,npwc->npqc', aw, xu, precision=lax.Precision.HIGHEST)

    def conv(v, w):
        return lax.conv_general_dilated(
            v, w, (1, 1), 'SAME',
            dimension_numbers=('NHWC', 'HWIO', 'NHWC'),
            precision=lax.Precision.HIGHEST)

    def bn(v, stats):
        sc, bi = _fold_bn(*stats)
        return v * sc + bi

    residual = bn(conv(xu, params['w_up']), params['bn_up'])
    out = jax.nn.relu(bn(conv(xu, params['w1']), params['bn1']))
    out = jax.nn.relu(bn(conv(out, params['w2']), params['bn2']) + residual)
    return jnp.transpose(out, (0, 3, 1, 2))


if __name__ == "__main__":
    key = jax.random.PRNGKey(0)
    kx, kp = jax.random.split(key)

    N, inplanes, planes, H, W = 2, 4, 8, 16, 16
    x = jax.random.normal(kx, (N, inplanes, H, W), jnp.float32)   # NCHW like PyTorch
    params = init_params(kp, inplanes, planes)

    out = jax.block_until_ready(jax.jit(upsample_basic_block)(x, params))
    ref = jax.block_until_ready(ref_forward(x, params, scale=2))

    # Kernel uses bf16 matmul operands (incl. the folded width-upsample) with f32
    # accumulation; tolerance reflects bf16 operand rounding.  Real bugs (wrong tap /
    # BN / residual / halo row) would be O(1) off.
    np.testing.assert_allclose(np.asarray(out), np.asarray(ref), rtol=5e-2, atol=5e-2)

    print("KERNEL_OK")
</pallas_src>

<mosaic_0001>
module attributes {stable_mosaic.version = 11 : i64} {
  func.func @kernel(%arg0: i32, %arg1: i32, %arg2: memref<1x36x64xbf16, #tpu.memory_space<vmem>>, %arg3: memref<3x64x256xbf16, #tpu.memory_space<vmem>>, %arg4: memref<3x256x256xbf16, #tpu.memory_space<vmem>>, %arg5: memref<1x64x256xbf16, #tpu.memory_space<vmem>>, %arg6: memref<1x256xf32, #tpu.memory_space<vmem>>, %arg7: memref<1x256xf32, #tpu.memory_space<vmem>>, %arg8: memref<1x32x256xf32, #tpu.memory_space<vmem>>, %arg9: memref<34x256xbf16, #tpu.memory_space<vmem>>) attributes {dimension_semantics = [#tpu.dimension_semantics<parallel>, #tpu.dimension_semantics<parallel>], iteration_bounds = array<i64: 2, 1>, scalar_prefetch = 0 : i64, scratch_operands = 1 : i64, tpu.core_type = #tpu.core_type<tc>, window_params = [{transform_indices = @transform_0, window_bounds = array<i64: 1, 36, 64>}, {pipeline_mode = #tpu.pipeline_mode<synchronous>, transform_indices = @transform_1, window_bounds = array<i64: 3, 64, 256>}, {pipeline_mode = #tpu.pipeline_mode<synchronous>, transform_indices = @transform_2, window_bounds = array<i64: 3, 256, 256>}, {pipeline_mode = #tpu.pipeline_mode<synchronous>, transform_indices = @transform_3, window_bounds = array<i64: 1, 64, 256>}, {pipeline_mode = #tpu.pipeline_mode<synchronous>, transform_indices = @transform_4, window_bounds = array<i64: 1, 256>}, {pipeline_mode = #tpu.pipeline_mode<synchronous>, transform_indices = @transform_5, window_bounds = array<i64: 1, 256>}, {transform_indices = @transform_6, window_bounds = array<i64: 1, 32, 256>}]} {
    %c0 = arith.constant 0 : index
    %c0_0 = arith.constant 0 : index
    %c0_1 = arith.constant 0 : index
    %0 = vector.load %arg2[%c0, %c0_0, %c0_1] : memref<1x36x64xbf16, #tpu.memory_space<vmem>>, vector<1x34x64xbf16>
    %1 = vector.shape_cast %0 : vector<1x34x64xbf16> to vector<34x64xbf16>
    %c0_2 = arith.constant 0 : index
    %c0_3 = arith.constant 0 : index
    %c0_4 = arith.constant 0 : index
    %2 = vector.load %arg3[%c0_2, %c0_3, %c0_4] : memref<3x64x256xbf16, #tpu.memory_space<vmem>>, vector<1x64x256xbf16>
    %3 = vector.shape_cast %2 : vector<1x64x256xbf16> to vector<64x256xbf16>
    %cst = arith.constant dense<0.000000e+00> : vector<34x256xf32>
    %4 = tpu.matmul %1, %3, %cst {dimension_numbers = #tpu.dot_dimension_numbers<[1], [0], [0], [1], [0, 0, 1, 1], [], []>} : vector<34x64xbf16>, vector<64x256xbf16>, vector<34x256xf32> -> vector<34x256xf32>
    %c0_5 = arith.constant 0 : index
    %c1 = arith.constant 1 : index
    %c0_6 = arith.constant 0 : index
    %5 = vector.load %arg2[%c0_5, %c1, %c0_6] : memref<1x36x64xbf16, #tpu.memory_space<vmem>>, vector<1x34x64xbf16>
    %6 = vector.shape_cast %5 : vector<1x34x64xbf16> to vector<34x64xbf16>
    %c1_7 = arith.constant 1 : index
    %c0_8 = arith.constant 0 : index
    %c0_9 = arith.constant 0 : index
    %7 = vector.load %arg3[%c1_7, %c0_8, %c0_9] : memref<3x64x256xbf16, #tpu.memory_space<vmem>>, vector<1x64x256xbf16>
    %8 = vector.shape_cast %7 : vector<1x64x256xbf16> to vector<64x256xbf16>
    %cst_10 = arith.constant dense<0.000000e+00> : vector<34x256xf32>
    %9 = tpu.matmul %6, %8, %cst_10 {dimension_numbers = #tpu.dot_dimension_numbers<[1], [0], [0], [1], [0, 0, 1, 1], [], []>} : vector<34x64xbf16>, vector<64x256xbf16>, vector<34x256xf32> -> vector<34x256xf32>
    %10 = arith.addf %4, %9 : vector<34x256xf32>
    %c0_11 = arith.constant 0 : index
    %c2 = arith.constant 2 : index
    %c0_12 = arith.constant 0 : index
    %11 = vector.load %arg2[%c0_11, %c2, %c0_12] : memref<1x36x64xbf16, #tpu.memory_space<vmem>>, vector<1x34x64xbf16>
    %12 = vector.shape_cast %11 : vector<1x34x64xbf16> to vector<34x64xbf16>
    %c2_13 = arith.constant 2 : index
    %c0_14 = arith.constant 0 : index
    %c0_15 = arith.constant 0 : index
    %13 = vector.load %arg3[%c2_13, %c0_14, %c0_15] : memref<3x64x256xbf16, #tpu.memory_space<vmem>>, vector<1x64x256xbf16>
    %14 = vector.shape_cast %13 : vector<1x64x256xbf16> to vector<64x256xbf16>
    %cst_16 = arith.constant dense<0.000000e+00> : vector<34x256xf32>
    %15 = tpu.matmul %12, %14, %cst_16 {dimension_numbers = #tpu.dot_dimension_numbers<[1], [0], [0], [1], [0, 0, 1, 1], [], []>} : vector<34x64xbf16>, vector<64x256xbf16>, vector<34x256xf32> -> vector<34x256xf32>
    %16 = arith.addf %10, %15 : vector<34x256xf32>
    %c0_17 = arith.constant 0 : index
    %c0_18 = arith.constant 0 : index
    %17 = vector.load %arg6[%c0_17, %c0_18] : memref<1x256xf32, #tpu.memory_space<vmem>>, vector<1x256xf32>
    %18 = vector.broadcast %17 : vector<1x256xf32> to vector<34x256xf32>
    %19 = arith.addf %16, %18 : vector<34x256xf32>
    %cst_19 = arith.constant 0.000000e+00 : f32
    %20 = vector.broadcast %cst_19 : f32 to vector<34x256xf32>
    %21 = arith.maximumf %19, %20 : vector<34x256xf32>
    %22 = tpu.iota {dimensions = array<i32: 0>} : vector<34x1xi32>
    %c-1_i32 = arith.constant -1 : i32
    %23 = vector.broadcast %c-1_i32 : i32 to vector<34x1xi32>
    %24 = arith.addi %23, %22 : vector<34x1xi32>
    %c0_i32 = arith.constant 0 : i32
    %25 = vector.broadcast %c0_i32 : i32 to vector<34x1xi32>
    %26 = arith.cmpi sge, %24, %25 : vector<34x1xi32>
    %c32_i32 = arith.constant 32 : i32
    %27 = vector.broadcast %c32_i32 : i32 to vector<34x1xi32>
    %28 = arith.cmpi slt, %24, %27 : vector<34x1xi32>
    %29 = arith.andi %26, %28 : vector<34x1xi1>
    %cst_20 = arith.constant 0.000000e+00 : f32
    %30 = vector.shape_cast %29 : vector<34x1xi1> to vector<34x1xi1>
    %31 = vector.broadcast %30 : vector<34x1xi1> to vector<34x256xi1>
    %32 = vector.broadcast %cst_20 : f32 to vector<34x256xf32>
    %33 = arith.select %31, %21, %32 : vector<34x256xi1>, vector<34x256xf32>
    %34 = arith.truncf %33 : vector<34x256xf32> to vector<34x256xbf16>
    %c0_21 = arith.constant 0 : index
    %c0_22 = arith.constant 0 : index
    %35 = vector.load %arg9[%c0_21, %c0_22] : memref<34x256xbf16, #tpu.memory_space<vmem>>, vector<34x256xbf16>
    tpu.vector_store %arg9[%c0_21, %c0_22], %34 {strides = array<i32>} : memref<34x256xbf16, #tpu.memory_space<vmem>>, vector<34x256xbf16>,
    %c0_23 = arith.constant 0 : index
    %c0_24 = arith.constant 0 : index
    %36 = vector.load %arg9[%c0_23, %c0_24] : memref<34x256xbf16, #tpu.memory_space<vmem>>, vector<32x256xbf16>
    %c0_25 = arith.constant 0 : index
    %c0_26 = arith.constant 0 : index
    %c0_27 = arith.constant 0 : index
    %37 = vector.load %arg4[%c0_25, %c0_26, %c0_27] : memref<3x256x256xbf16, #tpu.memory_space<vmem>>, vector<1x256x256xbf16>
    %38 = vector.shape_cast %37 : vector<1x256x256xbf16> to vector<256x256xbf16>
    %cst_28 = arith.constant dense<0.000000e+00> : vector<32x256xf32>
    %39 = tpu.matmul %36, %38, %cst_28 {dimension_numbers = #tpu.dot_dimension_numbers<[1], [0], [0], [1], [0, 0, 1, 1], [], []>} : vector<32x256xbf16>, vector<256x256xbf16>, vector<32x256xf32> -> vector<32x256xf32>
    %c1_29 = arith.constant 1 : index
    %c0_30 = arith.constant 0 : index
    %40 = vector.load %arg9[%c1_29, %c0_30] : memref<34x256xbf16, #tpu.memory_space<vmem>>, vector<32x256xbf16>
    %c1_31 = arith.constant 1 : index
    %c0_32 = arith.constant 0 : index
    %c0_33 = arith.constant 0 : index
    %41 = vector.load %arg4[%c1_31, %c0_32, %c0_33] : memref<3x256x256xbf16, #tpu.memory_space<vmem>>, vector<1x256x256xbf16>
    %42 = vector.shape_cast %41 : vector<1x256x256xbf16> to vector<256x256xbf16>
    %cst_34 = arith.constant dense<0.000000e+00> : vector<32x256xf32>
    %43 = tpu.matmul %40, %42, %cst_34 {dimension_numbers = #tpu.dot_dimension_numbers<[1], [0], [0], [1], [0, 0, 1, 1], [], []>} : vector<32x256xbf16>, vector<256x256xbf16>, vector<32x256xf32> -> vector<32x256xf32>
    %44 = arith.addf %39, %43 : vector<32x256xf32>
    %c2_35 = arith.constant 2 : index
    %c0_36 = arith.constant 0 : index
    %45 = vector.load %arg9[%c2_35, %c0_36] : memref<34x256xbf16, #tpu.memory_space<vmem>>, vector<32x256xbf16>
    %c2_37 = arith.constant 2 : index
    %c0_38 = arith.constant 0 : index
    %c0_39 = arith.constant 0 : index
    %46 = vector.load %arg4[%c2_37, %c0_38, %c0_39] : memref<3x256x256xbf16, #tpu.memory_space<vmem>>, vector<1x256x256xbf16>
    %47 = vector.shape_cast %46 : vector<1x256x256xbf16> to vector<256x256xbf16>
    %cst_40 = arith.constant dense<0.000000e+00> : vector<32x256xf32>
    %48 = tpu.matmul %45, %47, %cst_40 {dimension_numbers = #tpu.dot_dimension_numbers<[1], [0], [0], [1], [0, 0, 1, 1], [], []>} : vector<32x256xbf16>, vector<256x256xbf16>, vector<32x256xf32> -> vector<32x256xf32>
    %49 = arith.addf %44, %48 : vector<32x256xf32>
    %c0_41 = arith.constant 0 : index
    %c2_42 = arith.constant 2 : index
    %c0_43 = arith.constant 0 : index
    %50 = vector.load %arg2[%c0_41, %c2_42, %c0_43] : memref<1x36x64xbf16, #tpu.memory_space<vmem>>, vector<1x32x64xbf16>
    %51 = vector.shape_cast %50 : vector<1x32x64xbf16> to vector<32x64xbf16>
    %c0_44 = arith.constant 0 : index
    %c0_45 = arith.constant 0 : index
    %c0_46 = arith.constant 0 : index
    %52 = vector.load %arg5[%c0_44, %c0_45, %c0_46] : memref<1x64x256xbf16, #tpu.memory_space<vmem>>, vector<1x64x256xbf16>
    %53 = vector.shape_cast %52 : vector<1x64x256xbf16> to vector<64x256xbf16>
    %cst_47 = arith.constant dense<0.000000e+00> : vector<32x256xf32>
    %54 = tpu.matmul %51, %53, %cst_47 {dimension_numbers = #tpu.dot_dimension_numbers<[1], [0], [0], [1], [0, 0, 1, 1], [], []>} : vector<32x64xbf16>, vector<64x256xbf16>, vector<32x256xf32> -> vector<32x256xf32>
    %55 = arith.addf %49, %54 : vector<32x256xf32>
    %c0_48 = arith.constant 0 : index
    %c0_49 = arith.constant 0 : index
    %56 = vector.load %arg7[%c0_48, %c0_49] : memref<1x256xf32, #tpu.memory_space<vmem>>, vector<1x256xf32>
    %57 = vector.broadcast %56 : vector<1x256xf32> to vector<32x256xf32>
    %58 = arith.addf %55, %57 : vector<32x256xf32>
    %cst_50 = arith.constant 0.000000e+00 : f32
    %59 = vector.broadcast %cst_50 : f32 to vector<32x256xf32>
    %60 = arith.maximumf %58, %59 : vector<32x256xf32>
    %c0_51 = arith.constant 0 : index
    %c0_52 = arith.constant 0 : index
    %c0_53 = arith.constant 0 : index
    %61 = vector.load %arg8[%c0_51, %c0_52, %c0_53] : memref<1x32x256xf32, #tpu.memory_space<vmem>>, vector<1x32x256xf32>
    %62 = vector.shape_cast %61 : vector<1x32x256xf32> to vector<32x256xf32>
    %63 = vector.shape_cast %60 : vector<32x256xf32> to vector<1x32x256xf32>
    tpu.vector_store %arg8[%c0_51, %c0_52, %c0_53], %63 {strides = array<i32>} : memref<1x32x256xf32, #tpu.memory_space<vmem>>, vector<1x32x256xf32>,
    return
  }
  func.func @transform_0(%arg0: i32, %arg1: i32) -> (i32, i32, i32) {
    %c0_i32 = arith.constant 0 : i32
    %c0_i32_0 = arith.constant 0 : i32
    %c0_i32_1 = arith.constant 0 : i32
    return %arg0, %c0_i32, %c0_i32_0 : i32, i32, i32
  }
  func.func @transform_1(%arg0: i32, %arg1: i32) -> (i32, i32, i32) {
    %c0_i32 = arith.constant 0 : i32
    %c0_i32_0 = arith.constant 0 : i32
    %c0_i32_1 = arith.constant 0 : i32
    %c0_i32_2 = arith.constant 0 : i32
    return %c0_i32, %c0_i32_0, %c0_i32_1 : i32, i32, i32
  }
  func.func @transform_2(%arg0: i32, %arg1: i32) -> (i32, i32, i32) {
    %c0_i32 = arith.constant 0 : i32
    %c0_i32_0 = arith.constant 0 : i32
    %c0_i32_1 = arith.constant 0 : i32
    %c0_i32_2 = arith.constant 0 : i32
    return %c0_i32, %c0_i32_0, %c0_i32_1 : i32, i32, i32
  }
  func.func @transform_3(%arg0: i32, %arg1: i32) -> (i32, i32, i32) {
    %c0_i32 = arith.constant 0 : i32
    %c0_i32_0 = arith.constant 0 : i32
    %c0_i32_1 = arith.constant 0 : i32
    %c0_i32_2 = arith.constant 0 : i32
    return %c0_i32, %c0_i32_0, %c0_i32_1 : i32, i32, i32
  }
  func.func @transform_4(%arg0: i32, %arg1: i32) -> (i32, i32) {
    %c0_i32 = arith.constant 0 : i32
    %c0_i32_0 = arith.constant 0 : i32
    %c0_i32_1 = arith.constant 0 : i32
    return %c0_i32, %c0_i32_0 : i32, i32
  }
  func.func @transform_5(%arg0: i32, %arg1: i32) -> (i32, i32) {
    %c0_i32 = arith.constant 0 : i32
    %c0_i32_0 = arith.constant 0 : i32
    %c0_i32_1 = arith.constant 0 : i32
    return %c0_i32, %c0_i32_0 : i32, i32
  }
  func.func @transform_6(%arg0: i32, %arg1: i32) -> (i32, i32, i32) {
    %c0_i32 = arith.constant 0 : i32
    %c0_i32_0 = arith.constant 0 : i32
    return %arg0, %arg1, %c0_i32 : i32, i32, i32
  }
}

</mosaic_0001>

<bundles_post_ra>
// kernel: tile.18
= control target key start
LH: loop header
LB: loop body
LE: loop exit
PB: predicated region body
PF: predicated region fallthrough
CT: control target
= control target key end

     0   :  { %s40_s0 = inlined_call_operand.vmem [shape: f32[8], index: 0, kind: input, shape index: {}]   ;;  %s41_s1 = inlined_call_operand.vmem [shape: f32[32,8], index: 1, kind: output, shape index: {}]  }
   0x1   :  { %v4_v0 = vld [vmem:[%s40_s0] ss:$0 sm:$0xff] }
   0x2   :  { %5 = vst [vmem:[%s41_s1] sm:$0xff] %v4_v0  ;;  %12 = vst [vmem:[%s41_s1 + $0x8] sm:$0xff] %v4_v0 }
   0x3   :  { %13 = vst [vmem:[%s41_s1 + $0x10] sm:$0xff] %v4_v0  ;;  %14 = vst [vmem:[%s41_s1 + $0x18] sm:$0xff] %v4_v0 }

// kernel: tile.19
= control target key start
LH: loop header
LB: loop body
LE: loop exit
PB: predicated region body
PF: predicated region fallthrough
CT: control target
= control target key end

     0   :  { %s7_s6 = smov 3  ;;  %s21_s9 = smov 3  ;;  %vm4_vm0 = vcmask 64512   ;;  %vm11_vm1 = vcmask 1048512   ;;  %vm18_vm2 = vcmask 982912   ;;  %vm25_vm3 = vcmask 917312   ;;  %s232_s0 = inlined_call_operand.vmem [shape: f32[32,8], index: 0, kind: input, shape index: {}]   ;;  %s233_s1 = inlined_call_operand.vmem [shape: f32[1,256], index: 1, kind: output, shape index: {}]  }
   0x1   :  { %v122_v0 = vld [vmem:[%s232_s0 + $0xf] ss:$16 sm:%s7_s6]   ;;  %s153_s10 = smov 120   ;;  %v124_v1 = vld [vmem:[%s232_s0 + $0xd] ss:$16 sm:%s21_s9]   ;;  %s14_s13 = smov 3 }
   0x2   :  { %9 = vrot.lane.b32.xlu0 %v122_v0, %s153_s10  ;;  %s154_s14 = smov 104   ;;  %v123_v2 = vld [vmem:[%s232_s0 + $0xe] ss:$16 sm:%s14_s13]   ;;  %s28_s17 = smov 3  ;;  %vm32_vm4 = vcmask 851712   ;;  %vm39_vm5 = vcmask 786112  }
   0x3   :  { %23 = vrot.lane.b32.xlu1 %v124_v1, %s154_s14  ;;  %v125_v3 = vld [vmem:[%s232_s0 + $0xc] ss:$16 sm:%s28_s17]   ;;  %s35_s20 = smov 3  ;;  %s42_s21 = smov 3  ;;  %vm46_vm6 = vcmask 720512   ;;  %vm53_vm7 = vcmask 654912  }
   0x4   :  { %s155_s22 = smov 112   ;;  %s156_s23 = smov 96   ;;  %v126_v4 = vld [vmem:[%s232_s0 + $0xb] ss:$16 sm:%s35_s20]   ;;  %v127_v5 = vld [vmem:[%s232_s0 + $0xa] ss:$16 sm:%s42_s21]  }
   0x5   :  { %s49_s28 = smov 3  ;;  %s56_s29 = smov 3  ;;  %vm60_vm8 = vcmask 589312   ;;  %vm67_vm9 = vcmask 523712   ;;  %vm74_vm10 = vcmask 458112   ;;  %vm81_vm11 = vcmask 392512  }
   0x6   :  { %16 = vrot.lane.b32.xlu0 %v123_v2, %s155_s22  ;;  %s157_s30 = smov 88   ;;  %s158_s2 = smov 80   ;;  %v128_v6 = vld [vmem:[%s232_s0 + $0x9] ss:$16 sm:%s49_s28]   ;;  %vm88_vm12 = vcmask 326912   ;;  %vm95_vm13 = vcmask 261312  }
   0x7   :  { %30 = vrot.lane.b32.xlu1 %v125_v3, %s156_s23  ;;  %v129_v7 = vld [vmem:[%s232_s0 + $0x8] ss:$16 sm:%s56_s29]   ;;  %s63_s7 = smov 3  ;;  %s70_s8 = smov 3  ;;  %vm102_vm14 = vcmask 195712   ;;  %vm109_vm15 = vcmask 130112  }
   0x8   :  { %s159_s9 = smov 72   ;;  %s160_s10 = smov 64   ;;  %v130_v8 = vld [vmem:[%s232_s0 + $0x7] ss:$16 sm:%s63_s7]   ;;  %v131_v9 = vld [vmem:[%s232_s0 + $0x6] ss:$16 sm:%s70_s8]  }
   0x9   :  { %s2_s13 = smov 3  ;;  %s77_s16 = smov 3 }
   0xa   :  { %37 = vrot.lane.b32.xlu0 %v126_v4, %s157_s30  ;;  %v3_v10 = vld [vmem:[%s232_s0] ss:$16 sm:%s2_s13]   ;;  %s84_s19 = smov 3  ;;  %s161_s20 = smov 56  }
   0xb   :  { %44 = vrot.lane.b32.xlu1 %v127_v5, %s158_s2  ;;  %5 = vst.msk [vmem:[#allocation0] ss:$8 sm:$0x3] %vm4_vm0, %v3_v10   ;;  %s162_s21 = smov 48   ;;  %v132_v11 = vld [vmem:[%s232_s0 + $0x5] ss:$16 sm:%s77_s16]  }
   0xc   :  { %v133_v12 = vld [vmem:[%s232_s0 + $0x4] ss:$16 sm:%s84_s19]   ;;  %s91_s26 = smov 3  ;;  %s98_s27 = smov 3 }
   0xd   :  { %s163_s28 = smov 40   ;;  %s164_s29 = smov 32   ;;  %v134_v13 = vld [vmem:[%s232_s0 + $0x3] ss:$16 sm:%s91_s26]   ;;  %v135_v14 = vld [vmem:[%s232_s0 + $0x2] ss:$16 sm:%s98_s27]  }
   0xe   :  { %51 = vrot.lane.b32.xlu0 %v128_v6, %s159_s9  ;;  %s105_s5 = smov 3  ;;  %s165_s6 = smov 24  }
   0xf   :  { %58 = vrot.lane.b32.xlu1 %v129_v7, %s160_s10  ;;  %s166_s7 = smov 16   ;;  %v136_v15 = vld [vmem:[%s232_s0 + $0x1] ss:$16 sm:%s105_s5]   ;;  %s167_s0 = smov 8  }
  0x12   :  { %65 = vrot.lane.b32.xlu0 %v130_v8, %s161_s20 }
  0x13   :  { %72 = vrot.lane.b32.xlu1 %v131_v9, %s162_s21 }
  0x16   :  { %79 = vrot.lane.b32.xlu0 %v132_v11, %s163_s28 }
  0x17   :  { %86 = vrot.lane.b32.xlu1 %v133_v12, %s164_s29 }
  0x1a   :  { %93 = vrot.lane.b32.xlu0 %v134_v13, %s165_s6 }
  0x1b   :  { %100 = vrot.lane.b32.xlu1 %v135_v14, %s166_s7 }
  0x1e   :  { %107 = vrot.lane.b32.xlu0 %v136_v15, %s167_s0 }
  0x74   :  { %v10_v16 = vpop.permute.xlu0 %9  }
  0x75   :  { %12 = vst.msk [vmem:[#allocation0] ss:$8 sm:$0x3] %vm11_vm1, %v10_v16   ;;  %v24_v17 = vpop.permute.xlu1 %23  }
  0x78   :  { %v17_v18 = vpop.permute.xlu0 %16  }
  0x79   :  { %19 = vst.msk [vmem:[#allocation0] ss:$8 sm:$0x3] %vm18_vm2, %v17_v18   ;;  %v31_v19 = vpop.permute.xlu1 %30  }
  0x7a   :  { %26 = vst.msk [vmem:[#allocation0] ss:$8 sm:$0x3] %vm25_vm3, %v24_v17  }
  0x7b   :  { %33 = vst.msk [vmem:[#allocation0] ss:$8 sm:$0x3] %vm32_vm4, %v31_v19  }
  0x7c   :  { %v38_v20 = vpop.permute.xlu0 %37  }
  0x7d   :  { %40 = vst.msk [vmem:[#allocation0] ss:$8 sm:$0x3] %vm39_vm5, %v38_v20   ;;  %v45_v21 = vpop.permute.xlu1 %44  }
  0x7e   :  { %47 = vst.msk [vmem:[#allocation0] ss:$8 sm:$0x3] %vm46_vm6, %v45_v21  }
  0x80   :  { %v52_v22 = vpop.permute.xlu0 %51  }
  0x81   :  { %54 = vst.msk [vmem:[#allocation0] ss:$8 sm:$0x3] %vm53_vm7, %v52_v22   ;;  %v59_v23 = vpop.permute.xlu1 %58  }
  0x82   :  { %61 = vst.msk [vmem:[#allocation0] ss:$8 sm:$0x3] %vm60_vm8, %v59_v23  }
  0x84   :  { %v66_v24 = vpop.permute.xlu0 %65  }
  0x85   :  { %68 = vst.msk [vmem:[#allocation0] ss:$8 sm:$0x3] %vm67_vm9, %v66_v24   ;;  %v73_v25 = vpop.permute.xlu1 %72  }
  0x86   :  { %75 = vst.msk [vmem:[#allocation0] ss:$8 sm:$0x3] %vm74_vm10, %v73_v25  }
  0x88   :  { %v80_v26 = vpop.permute.xlu0 %79  }
  0x89   :  { %82 = vst.msk [vmem:[#allocation0] ss:$8 sm:$0x3] %vm81_vm11, %v80_v26   ;;  %v87_v27 = vpop.permute.xlu1 %86  }
  0x8a   :  { %89 = vst.msk [vmem:[#allocation0] ss:$8 sm:$0x3] %vm88_vm12, %v87_v27  }
  0x8c   :  { %v94_v28 = vpop.permute.xlu0 %93  }
  0x8d   :  { %96 = vst.msk [vmem:[#allocation0] ss:$8 sm:$0x3] %vm95_vm13, %v94_v28   ;;  %v101_v29 = vpop.permute.xlu1 %100  }
  0x8e   :  { %103 = vst.msk [vmem:[#allocation0] ss:$8 sm:$0x3] %vm102_vm14, %v101_v29  }
  0x90   :  { %v108_v30 = vpop.permute.xlu0 %107  }
  0x91   :  { %110 = vst.msk [vmem:[#allocation0] ss:$8 sm:$0x3] %vm109_vm15, %v108_v30  }
  0x98   :  { %v114_v31 = vld [vmem:[#allocation0] sm:$0x1]  ;;  %v118_v32 = vld [vmem:[#allocation0 + $0x8] sm:$0x1] }
  0x99   :  { %116 = vst [vmem:[%s233_s1] sm:$0x1] %v114_v31  ;;  %137 = vst [vmem:[%s233_s1 + $0x1] sm:$0x1] %v118_v32 }

// kernel: upsample_basic_block.1
= control target key start
LH: loop header
LB: loop body
LE: loop exit
PB: predicated region body
PF: predicated region fallthrough
CT: control target
= control target key end

     0   :  { %s2517_s21 = smov 0   ;;  %s2519_s22 = smov 0   ;;  %s3118_s0 = inlined_call_operand.vmem [shape: bf16[2,36,64], index: 0, kind: input, shape index: {}]   ;;  %s3119_s1 = inlined_call_operand.vmem [shape: bf16[3,64,256], index: 1, kind: input, shape index: {}]   ;;  %s3120_s2 = inlined_call_operand.vmem [shape: bf16[3,256,256], index: 2, kind: input, shape index: {}]   ;;  %s3121_s3 = inlined_call_operand.vmem [shape: bf16[1,64,256], index: 3, kind: input, shape index: {}]   ;;  %s3122_s4 = inlined_call_operand.vmem [shape: f32[1,256], index: 4, kind: input, shape index: {}]   ;;  %s3123_s5 = inlined_call_operand.vmem [shape: f32[1,256], index: 5, kind: input, shape index: {}]   ;;  %s3124_s6 = inlined_call_operand.vmem [shape: f32[2,32,256], index: 6, kind: output, shape index: {}]  }
   0x1   :  { %s2521_s23 = smov 0  }
   0x2 LB: > { %s28_s24 = sadd.s32 1, %s2474_s22  ;;  %p1918_p0 = scmp.ge.s32.totalorder %s2478_s23, 1  ;;  %s2478_s23 = sphi %s2521_s23, %s16_s23   ;;  %s2474_s22 = sphi %s2519_s22, %s3126_s22   ;;  %s2470_s21 = sphi %s2517_s21, %s3125_s21  }
   0x3   : > { %p30_p1 = scmp.ge.s32.totalorder %s28_s24, 2  ;;  %p226_p2 = scmp.lt.s32.totalorder %s2478_s23, 3 }
   0x5   : > { %s3128_s24 = smov (%p30_p1, %s28_s24), 0  ;;  %p227_p3 = pnand %p1918_p0, %p226_p2 }
   0x6   : > { %v2244_v0 = vld [vmem:[%s3119_s1 + $0x44] ss:$8 sps:$4 sm:$0xff] (!%p227_p3)   ;;  %p261_p4 = scmp.lt.s32.totalorder (!%p227_p3), %s2470_s21, 1  ;;  %v2246_v1 = vld [vmem:[%s3119_s1 + $0x40] ss:$8 sps:$4 sm:$0xff] (!%p227_p3)   ;;  %v2480_v2 = vmov (!%p227_p3), 0  }
   0x7   : > { %230 = sbr.rel (%p227_p3) target bundleno = 604 (0x25c), region = 44  ;;  %420 = vmatprep.mubr.bf16.mxu0 (!%p227_p3), %v2480_v2  ;;  %388 = vmatprep.subr.bf16.mxu0 (!%p227_p3), %v2244_v0  ;;  %v2247_v3 = vld [vmem:[%s3119_s1 + $0x54] ss:$8 sps:$4 sm:$0xff] (!%p227_p3)   ;;  %v2249_v4 = vld [vmem:[%s3119_s1 + $0x50] ss:$8 sps:$4 sm:$0xff] (!%p227_p3)   ;;  %vm378_vm1 = vcmask (!%p227_p3), 523264  }
   0x8   : > { %389 = vmatpush1.bf16.msra.mxu0 (!%p227_p3), %v2246_v1  ;;  %v2250_v5 = vld [vmem:[%s3119_s1 + $0x64] ss:$8 sps:$4 sm:$0xff] (!%p227_p3)   ;;  %v2252_v6 = vld [vmem:[%s3119_s1 + $0x60] ss:$8 sps:$4 sm:$0xff] (!%p227_p3)   ;;  %v2253_v7 = vld [vmem:[%s3119_s1 + $0x74] ss:$8 sps:$4 sm:$0xff] (!%p227_p3)  }
   0x9   : > { %390 = vmatprep.subr.bf16.mxu0 (!%p227_p3), %v2247_v3  ;;  %v2255_v12 = vld [vmem:[%s3119_s1 + $0x70] ss:$8 sps:$4 sm:$0xff] (!%p227_p3)   ;;  %v2260_v19 = vld [vmem:[%s3119_s1 + $0x4] ss:$8 sps:$4 sm:$0xff] (!%p227_p3)   ;;  %vm314_vm0 = vsmask.f32 (!%p227_p3), 7424 }
   0xa   : > { %v2258_v21 = vld [vmem:[%s3119_s1] ss:$8 sps:$4 sm:$0xff] (!%p227_p3)   ;;  %v2263_v25 = vld [vmem:[%s3119_s1 + $0x14] ss:$8 sps:$4 sm:$0xff] (!%p227_p3)   ;;  %v2261_v26 = vld [vmem:[%s3119_s1 + $0x10] ss:$8 sps:$4 sm:$0xff] (!%p227_p3)  }
   0xb   : > { %v2267_v29 = vld [vmem:[%s3119_s1 + $0x24] ss:$8 sps:$4 sm:$0xff] (!%p227_p3)   ;;  %v2265_v30 = vld [vmem:[%s3119_s1 + $0x20] ss:$8 sps:$4 sm:$0xff] (!%p227_p3)   ;;  %v2288_v33 = vld [vmem:[%s3120_s2 + $0x14] ss:$8 sps:$4 sm:$0xff] (!%p227_p3)  }
   0xc   : > { %391 = vmatpush1.bf16.msra.mxu0 (!%p227_p3), %v2249_v4  ;;  %v2285_v31 = vld [vmem:[%s3120_s2 + $0x4] ss:$8 sps:$4 sm:$0xff] (!%p227_p3)   ;;  %v2287_v32 = vld [vmem:[%s3120_s2] ss:$8 sps:$4 sm:$0xff] (!%p227_p3)   ;;  %v2270_v35 = vld [vmem:[%s3119_s1 + $0x34] ss:$8 sps:$4 sm:$0xff] (!%p227_p3)  }
   0xd   : > { %392 = vmatprep.subr.bf16.mxu0 (!%p227_p3), %v2250_v5  ;;  %1326 = vmatprep.subr.bf16.mxu1 (!%p227_p3), %v2285_v31  ;;  %v2290_v36 = vld [vmem:[%s3120_s2 + $0x10] ss:$8 sps:$4 sm:$0xff] (!%p227_p3)   ;;  %v2291_v37 = vld [vmem:[%s3120_s2 + $0x24] ss:$8 sps:$4 sm:$0xff] (!%p227_p3)   ;;  %v2293_v41 = vld [vmem:[%s3120_s2 + $0x20] ss:$8 sps:$4 sm:$0xff] (!%p227_p3)  }
   0xe   : > { %s3130_s21 = smov (!%p261_p4, %s2470_s21), 1  ;;  %1327 = vmatpush1.bf16.msra.mxu1 %v2287_v32  ;;  %v2268_v38 = vld [vmem:[%s3119_s1 + $0x30] ss:$8 sps:$4 sm:$0xff]   ;;  %v2273_v40 = vld [vmem:[%s3119_s1 + $0x84] ss:$8 sps:$4 sm:$0xff]   ;;  %vm573_vm2 = vcmask 1046528  }
   0xf   : > { %s2218_s11 = smul.u32 20, %s3130_s21  ;;  %1328 = vmatprep.subr.bf16.mxu1 %v2288_v33  ;;  %v2271_v43 = vld [vmem:[%s3119_s1 + $0x80] ss:$8 sps:$4 sm:$0xff]   ;;  %v2276_v44 = vld [vmem:[%s3119_s1 + $0x94] ss:$8 sps:$4 sm:$0xff]   ;;  %vm2481_vm4 = vmmov 1  }
  0x10   : > { %393 = vmatpush1.bf16.msra.mxu0 %v2252_v6  ;;  %v2274_v45 = vld [vmem:[%s3119_s1 + $0x90] ss:$8 sps:$4 sm:$0xff]   ;;  %v2279_v46 = vld [vmem:[%s3119_s1 + $0xa4] ss:$8 sps:$4 sm:$0xff]   ;;  %v2277_v47 = vld [vmem:[%s3119_s1 + $0xa0] ss:$8 sps:$4 sm:$0xff]  }
  0x11   : > { %s2563_s18 = scalar_lea.vmem %s3118_s0, %s2218_s11  ;;  %394 = vmatprep.subr.bf16.mxu0 %v2253_v7  ;;  %v2283_v48 = vld [vmem:[%s3119_s1 + $0xb4] ss:$8 sps:$4 sm:$0xff]   ;;  %v2281_v49 = vld [vmem:[%s3119_s1 + $0xb0] ss:$8 sps:$4 sm:$0xff]   ;;  %v2299_v60 = vld [vmem:[%s3120_s2 + $0x104] ss:$8 sps:$4 sm:$0xff]  }
  0x12   : > { %v278_v8 = vld [vmem:[%s2563_s18] sm:$0xf]  ;;  %v2567_v9 = vld [vmem:[%s2563_s18 + $0x4] sm:$0xf]  ;;  %v2571_v11 = vld [vmem:[%s2563_s18 + $0x8] sm:$0xff]   ;;  %1329 = vmatpush1.bf16.msra.mxu1 %v2290_v36  ;;  %s2164_s16 = sshll.u32 %s3130_s21, 6 }
  0x13   : > { %v1930_v10 = vcombine.low %v278_v8, %v2567_v9  ;;  %v323_v15 = vshll.u32 %v2571_v11, 16  ;;  %v2578_v16 = vld [vmem:[%s2563_s18 + $0x10] ss:$0 sps:$4 sm:$0x33]   ;;  %v327_v22 = vshrl.u32 %v2571_v11, 16  ;;  %1330 = vmatprep.subr.bf16.mxu1 %v2291_v37  ;;  %v575_v54 = vrot.slane %v2571_v11, 1  ;;  %s3099_s20 = scalar_lea.vmem %s3124_s6, %s2164_s16 }
  0x14   : > { %395 = vmatpush1.bf16.msra.mxu0 %v2255_v12  ;;  %v331_v23 = vshll.u32 %v2578_v16, 16  ;;  %v335_v39 = vshrl.u32 %v2578_v16, 16  ;;  %v560_v50 = vld [vmem:[%s2563_s18] sm:$0xe]  ;;  %v577_v56 = vrot.slane %v2578_v16, 1 }
  0x15   : > { %v316_v13 = vshrl.u32 %v1930_v10, 16  ;;  %v318_v14 = vshll.u32 %v1930_v10, 16  ;;  %v325_v18 = vrot.slane %v323_v15, 1  ;;  %499 = vmatprep.subr.bf16.mxu0 %v2260_v19  ;;  %v2280_v51 = vld [vmem:[%s2563_s18 + $0x10] ss:$0 sps:$4 sm:$0x11]   ;;  %v1964_v52 = vcombine.low %v560_v50, %v2567_v9 }
  0x16   : > { %v333_v28 = vrot.slane %v331_v23, 1  ;;  %1331 = vmatpush1.bf16.msra.mxu1 %v2293_v41  ;;  %v578_v57 = vsel %vm573_vm2, %v575_v54, %v577_v56  ;;  %v2294_v58 = vld [vmem:[%s3120_s2 + $0x34] ss:$8 sps:$4 sm:$0xff]   ;;  %v2296_v59 = vld [vmem:[%s3120_s2 + $0x30] ss:$8 sps:$4 sm:$0xff]  }
  0x17   : > { %v320_v17 = vrot.slane %v318_v14, 1  ;;  %v329_v27 = vor.u32 %v327_v22, %v325_v18  ;;  %v574_v53 = vrot.slane %v1964_v52, 1  ;;  %1332 = vmatprep.subr.bf16.mxu1 %v2294_v58  ;;  %v2297_v61 = vld [vmem:[%s3120_s2 + $0x100] ss:$8 sps:$4 sm:$0xff]   ;;  %v2300_v62 = vld [vmem:[%s3120_s2 + $0x44] ss:$8 sps:$4 sm:$0xff]  }
  0x18   : > { %v337_v42 = vor.u32 %v335_v39, %v333_v28  ;;  %v2302_v63 = vld [vmem:[%s3120_s2 + $0x40] ss:$8 sps:$4 sm:$0xff]   ;;  %v2305_v0 = vld [vmem:[%s3120_s2 + $0x114] ss:$8 sps:$4 sm:$0xff]   ;;  %v2303_v1 = vld [vmem:[%s3120_s2 + $0x110] ss:$8 sps:$4 sm:$0xff]  }
  0x19   : > { %v321_v20 = vor.u32 %v320_v17, %v316_v13  ;;  %v334_v34 = vsel %vm314_vm0, %v329_v27, %v333_v28  ;;  %v576_v55 = vsel %vm573_vm2, %v574_v53, %v575_v54  ;;  %v2306_v3 = vld [vmem:[%s3120_s2 + $0x54] ss:$8 sps:$4 sm:$0xff]   ;;  %v2308_v4 = vld [vmem:[%s3120_s2 + $0x50] ss:$8 sps:$4 sm:$0xff]   ;;  %v2311_v5 = vld [vmem:[%s3120_s2 + $0x124] ss:$8 sps:$4 sm:$0xff]  }
  0x1a   : > { %1333 = vmatpush1.bf16.msra.mxu1 %v2296_v59  ;;  %v2309_v6 = vld [vmem:[%s3120_s2 + $0x120] ss:$8 sps:$4 sm:$0xff]   ;;  %v2312_v7 = vld [vmem:[%s3120_s2 + $0x64] ss:$8 sps:$4 sm:$0xff]   ;;  %v2315_v9 = vld [vmem:[%s3120_s2 + $0x130] ss:$8 sps:$4 sm:$0xff]   ;;  %v701_v59 = vlaneseq }
  0x1b   : > { %v326_v24 = vsel %vm314_vm0, %v321_v20, %v325_v18  ;;  %1334 = vmatprep.subr.bf16.mxu1 %v2300_v62  ;;  %v2314_v8 = vld [vmem:[%s3120_s2 + $0x60] ss:$8 sps:$4 sm:$0xff]   ;;  %v2320_v12 = vld [vmem:[%s3120_s2 + $0x70] ss:$8 sps:$4 sm:$0xff]   ;;  %v2323_v13 = vld [vmem:[%s3120_s2 + $0x144] ss:$8 sps:$4 sm:$0xff]  }
  0x1c   : > { %1941 = vmatmul.mubr.msk.bf16.vlgmr.msra.gmra.mrb[0].mxu0 %vm378_vm1, %v326_v24  ;;  %v2324_v14 = vld [vmem:[%s3120_s2 + $0x84] ss:$8 sps:$4 sm:$0xff]   ;;  %v2321_v15 = vld [vmem:[%s3120_s2 + $0x140] ss:$8 sps:$4 sm:$0xff]   ;;  %v2329_v16 = vld [vmem:[%s3120_s2 + $0x154] ss:$8 sps:$4 sm:$0xff]  }
  0x1d   : > { %500 = vmatpush1.bf16.msra.mxu0 %v2258_v21  ;;  %430 = vmatprep.mubr.bf16.mxu0 %v2480_v2  ;;  %v2326_v17 = vld [vmem:[%s3120_s2 + $0x80] ss:$8 sps:$4 sm:$0xff]   ;;  %v2327_v18 = vld [vmem:[%s3120_s2 + $0x150] ss:$8 sps:$4 sm:$0xff]   ;;  %v2330_v19 = vld [vmem:[%s3120_s2 + $0x94] ss:$8 sps:$4 sm:$0xff]  }
  0x1e   : > { %501 = vmatprep.subr.bf16.mxu0 %v2263_v25  ;;  %1335 = vmatpush1.bf16.msra.mxu1 %v2302_v63  ;;  %v2332_v20 = vld [vmem:[%s3120_s2 + $0x90] ss:$8 sps:$4 sm:$0xff]   ;;  %v2335_v21 = vld [vmem:[%s3120_s2 + $0x164] ss:$8 sps:$4 sm:$0xff]   ;;  %v2333_v22 = vld [vmem:[%s3120_s2 + $0x160] ss:$8 sps:$4 sm:$0xff]  }
  0x1f   : > { %1336 = vmatprep.subr.bf16.mxu1 %v2306_v3  ;;  %v2336_v23 = vld [vmem:[%s3120_s2 + $0xa4] ss:$8 sps:$4 sm:$0xff]   ;;  %v2338_v24 = vld [vmem:[%s3120_s2 + $0xa0] ss:$8 sps:$4 sm:$0xff]   ;;  %v2341_v25 = vld [vmem:[%s3120_s2 + $0x174] ss:$8 sps:$4 sm:$0xff]  }
  0x20   : > { %v2342_v27 = vld [vmem:[%s3120_s2 + $0xb4] ss:$8 sps:$4 sm:$0xff]   ;;  %v2344_v28 = vld [vmem:[%s3120_s2 + $0xb0] ss:$8 sps:$4 sm:$0xff]   ;;  %v2348_v31 = vld [vmem:[%s3120_s2 + $0xc4] ss:$8 sps:$4 sm:$0xff]  }
  0x21   : > { %502 = vmatpush1.bf16.msra.mxu0 %v2261_v26  ;;  %v2339_v26 = vld [vmem:[%s3120_s2 + $0x170] ss:$8 sps:$4 sm:$0xff]   ;;  %v2350_v32 = vld [vmem:[%s3120_s2 + $0xc0] ss:$8 sps:$4 sm:$0xff]   ;;  %v2353_v33 = vld [vmem:[%s3120_s2 + $0x194] ss:$8 sps:$4 sm:$0xff]  }
  0x22   : > { %503 = vmatprep.subr.bf16.mxu0 %v2267_v29  ;;  %1337 = vmatpush1.bf16.msra.mxu1 %v2308_v4  ;;  %v2347_v29 = vld [vmem:[%s3120_s2 + $0x184] ss:$8 sps:$4 sm:$0xff]   ;;  %v2356_v36 = vld [vmem:[%s3120_s2 + $0xd0] ss:$8 sps:$4 sm:$0xff]   ;;  %v2365_v41 = vld [vmem:[%s3120_s2 + $0x1b4] ss:$8 sps:$4 sm:$0xff]  }
  0x23   : > { %1338 = vmatprep.subr.bf16.mxu1 %v2312_v7  ;;  %v2359_v37 = vld [vmem:[%s3120_s2 + $0x1a4] ss:$8 sps:$4 sm:$0xff]   ;;  %v2389_v52 = vld [vmem:[%s3120_s2 + $0x1f4] ss:$8 sps:$4 sm:$0xff]   ;;  %v2387_v53 = vld [vmem:[%s3120_s2 + $0x1f0] ss:$8 sps:$4 sm:$0xff]  }
  0x24   : > { %1942 = vmatmul.mubr.msk.bf16.gmra.mrb[4].mxu0 %vm378_vm1, %v334_v34  ;;  %v2351_v34 = vld [vmem:[%s3120_s2 + $0x190] ss:$8 sps:$4 sm:$0xff]   ;;  %v2360_v39 = vld [vmem:[%s3120_s2 + $0xe4] ss:$8 sps:$4 sm:$0xff]   ;;  %v699_v4 = vld [vmem:[%s3122_s4] sm:$0x3] }
  0x25   : > { %504 = vmatpush1.bf16.msra.mxu0 %v2265_v30  ;;  %440 = vmatprep.mubr.bf16.mxu0 %v2480_v2  ;;  %v2345_v30 = vld [vmem:[%s3120_s2 + $0x180] ss:$8 sps:$4 sm:$0xff]   ;;  %v2383_v50 = vld [vmem:[%s3120_s2 + $0x1e4] ss:$8 sps:$4 sm:$0xff]  }
  0x26   : > { %505 = vmatprep.subr.bf16.mxu0 %v2270_v35  ;;  %1339 = vmatpush1.bf16.msra.mxu1 %v2314_v8  ;;  %v2354_v35 = vld [vmem:[%s3120_s2 + $0xd4] ss:$8 sps:$4 sm:$0xff]   ;;  %v2856_v54 = vld [vmem:[%s3121_s3 + $0x4] ss:$8 sps:$4 sm:$0xff]  }
  0x29   : > { %506 = vmatpush1.bf16.msra.mxu0 %v2268_v38  ;;  %v2357_v38 = vld [vmem:[%s3120_s2 + $0x1a0] ss:$8 sps:$4 sm:$0xff]  }
  0x2a   : > { %628 = vmatprep.subr.bf16.mxu0 %v2273_v40  ;;  %v2362_v40 = vld [vmem:[%s3120_s2 + $0xe0] ss:$8 sps:$4 sm:$0xff]  }
  0x2c   : > { %1943 = vmatmul.mubr.msk.bf16.gmra.mrb[8].mxu0 %vm378_vm1, %v337_v42  ;;  %v2363_v42 = vld [vmem:[%s3120_s2 + $0x1b0] ss:$8 sps:$4 sm:$0xff]  }
  0x2d   : > { %531 = vmatprep.mubr.bf16.mxu0 %v2480_v2 }
  0x34   : > { %1953 = vmatmul.mubr.msk.bf16.vlgmr.msra.gmra.mrb[0].mxu0 %vm378_vm1, %v1930_v10  ;;  %v2317_v10 = vld [vmem:[%s3120_s2 + $0x134] ss:$8 sps:$4 sm:$0xff]  }
  0x35   : > { %629 = vmatpush1.bf16.msra.mxu0 %v2271_v43  ;;  %541 = vmatprep.mubr.bf16.mxu0 %v2480_v2  ;;  %v2366_v43 = vld [vmem:[%s3120_s2 + $0xf4] ss:$8 sps:$4 sm:$0xff]  }
  0x36   : > { %630 = vmatprep.subr.bf16.mxu0 %v2276_v44  ;;  %v2368_v44 = vld [vmem:[%s3120_s2 + $0xf0] ss:$8 sps:$4 sm:$0xff]  }
  0x39   : > { %631 = vmatpush1.bf16.msra.mxu0 %v2274_v45  ;;  %v2371_v45 = vld [vmem:[%s3120_s2 + $0x1c4] ss:$8 sps:$4 sm:$0xff]  }
  0x3a   : > { %632 = vmatprep.subr.bf16.mxu0 %v2279_v46  ;;  %v2369_v46 = vld [vmem:[%s3120_s2 + $0x1c0] ss:$8 sps:$4 sm:$0xff]  }
  0x3c   : > { %1954 = vmatmul.mubr.msk.bf16.gmra.mrb[4].mxu0 %vm378_vm1, %v2571_v11  ;;  %v2318_v11 = vld [vmem:[%s3120_s2 + $0x74] ss:$8 sps:$4 sm:$0xff]  }
  0x3d   : > { %633 = vmatpush1.bf16.msra.mxu0 %v2277_v47  ;;  %551 = vmatprep.mubr.bf16.mxu0 %v2480_v2  ;;  %v2374_v47 = vld [vmem:[%s3120_s2 + $0x204] ss:$8 sps:$4 sm:$0xff]  }
  0x3e   : > { %634 = vmatprep.subr.bf16.mxu0 %v2283_v48  ;;  %1340 = vmatprep.subr.bf16.mxu1 %v2318_v11  ;;  %v2377_v48 = vld [vmem:[%s3120_s2 + $0x1d4] ss:$8 sps:$4 sm:$0xff]  }
  0x3f   : > { %1341 = vmatpush1.bf16.msra.mxu1 %v2320_v12 }
  0x40   : > { %1342 = vmatprep.subr.bf16.mxu1 %v2324_v14 }
  0x41   : > { %635 = vmatpush1.bf16.msra.mxu0 %v2281_v49  ;;  %v2375_v49 = vld [vmem:[%s3120_s2 + $0x1d0] ss:$8 sps:$4 sm:$0xff]  }
  0x42   : > { %1109 = vmatprep.subr.bf16.mxu0 %v2299_v60  ;;  %v2859_v60 = vshrl.u32 %v701_v59, 7 }
  0x43   : > { %1343 = vmatpush1.bf16.msra.mxu1 %v2326_v17 }
  0x44   : > { %1955 = vmatmul.mubr.msk.bf16.gmra.mrb[12].mxu0 %vm378_vm1, %v2280_v51  ;;  %1344 = vmatprep.subr.bf16.mxu1 %v2330_v19  ;;  %v2381_v51 = vld [vmem:[%s3120_s2 + $0x1e0] ss:$8 sps:$4 sm:$0xff]   ;;  %v737_v8 = vadd.s32 4294967295, %v2859_v60 }
  0x45   : > { %660 = vmatprep.mubr.bf16.mxu0 %v2480_v2 }
  0x46   : > { %vm742_vm3 = vcmp.ge.s32.totalorder %v737_v8, 0 }
  0x47   : > { %1345 = vmatpush1.bf16.msra.mxu1 %v2332_v20  ;;  %vm2448_vm5 = vmpackc.low %vm2481_vm4, %vm742_vm3 }
  0x48   : > { %1346 = vmatprep.subr.bf16.mxu1 %v2336_v23 }
  0x4b   : > { %1347 = vmatpush1.bf16.msra.mxu1 %v2338_v24 }
  0x4c   : > { %1973 = vmatmul.mubr.msk.bf16.vlgmr.msra.gmra.mrb[0].mxu0 %vm378_vm1, %v576_v55  ;;  %1348 = vmatprep.subr.bf16.mxu1 %v2342_v27  ;;  %v736_v27 = vadd.s32 32, %v2859_v60 }
  0x4d   : > { %670 = vmatprep.mubr.bf16.mxu0 %v2480_v2  ;;  %1110 = vmatpush1.bf16.msra.mxu0 %v2297_v61 }
  0x4e   : > { %1111 = vmatprep.subr.bf16.mxu0 %v2305_v0  ;;  %v703_v0 = vsub.s32 0, %v2859_v60 }
  0x4f   : > { %1349 = vmatpush1.bf16.msra.mxu1 %v2344_v28 }
  0x50   : > { %1350 = vmatprep.subr.bf16.mxu1 %v2348_v31  ;;  %v2872_v7 = vrot.slane %v699_v4, %v703_v0 }
  0x51   : > { %1112 = vmatpush1.bf16.msra.mxu0 %v2303_v1 }
  0x52   : > { %1113 = vmatprep.subr.bf16.mxu0 %v2311_v5  ;;  %v707_v5 = vsub.s32 1, %v2859_v60 }
  0x53   : > { %1351 = vmatpush1.bf16.msra.mxu1 %v2350_v32 }
  0x54   : > { %1974 = vmatmul.mubr.msk.bf16.gmra.mrb[4].mxu0 %vm378_vm1, %v578_v57  ;;  %1352 = vmatprep.subr.bf16.mxu1 %v2354_v35 }
  0x55   : > { %680 = vmatprep.mubr.bf16.mxu0 %v2480_v2  ;;  %1114 = vmatpush1.bf16.msra.mxu0 %v2309_v6 }
  0x56   : > { %1115 = vmatprep.subr.bf16.mxu0 %v2317_v10 }
  0x57   : > { %1353 = vmatpush1.bf16.msra.mxu1 %v2356_v36 }
  0x58   : > { %1354 = vmatprep.subr.bf16.mxu1 %v2360_v39 }
  0x59   : > { %1116 = vmatpush1.bf16.msra.mxu0 %v2315_v9  ;;  %v2877_v9 = vrot.slane %v699_v4, %v707_v5 }
  0x5a   : > { %1117 = vmatprep.subr.bf16.mxu0 %v2323_v13 }
  0x5b   : > { %1355 = vmatpush1.bf16.msra.mxu1 %v2362_v40 }
  0x5c   : > { %1975 = vmatmul.mubr.msk.bf16.gmra.mrb[16].mxu0 %vm378_vm1, %v577_v56  ;;  %1356 = vmatprep.subr.bf16.mxu1 %v2366_v43 }
  0x5d   : > { %1118 = vmatpush1.bf16.msra.mxu0 %v2321_v15 }
  0x5e   : > { %1119 = vmatprep.subr.bf16.mxu0 %v2329_v16 }
  0x5f   : > { %1357 = vmatpush1.bf16.msra.mxu1 %v2368_v44 }
  0x60   : > { %1592 = vmatprep.subr.bf16.mxu1 %v2374_v47 }
  0x61   : > { %1120 = vmatpush1.bf16.msra.mxu0 %v2327_v18 }
  0x62   : > { %1121 = vmatprep.subr.bf16.mxu0 %v2335_v21 }
  0x65   : > { %1122 = vmatpush1.bf16.msra.mxu0 %v2333_v22 }
  0x66   : > { %1123 = vmatprep.subr.bf16.mxu0 %v2341_v25 }
  0x69   : > { %1124 = vmatpush1.bf16.msra.mxu0 %v2339_v26 }
  0x6a   : > { %1125 = vmatprep.subr.bf16.mxu0 %v2347_v29 }
  0x6d   : > { %1126 = vmatpush1.bf16.msra.mxu0 %v2345_v30 }
  0x6e   : > { %1127 = vmatprep.subr.bf16.mxu0 %v2353_v33  ;;  %v2372_v33 = vld [vmem:[%s3120_s2 + $0x200] ss:$8 sps:$4 sm:$0xff]  }
  0x71   : > { %1128 = vmatpush1.bf16.msra.mxu0 %v2351_v34 }
  0x72   : > { %1129 = vmatprep.subr.bf16.mxu0 %v2359_v37 }
  0x75   : > { %1130 = vmatpush1.bf16.msra.mxu0 %v2357_v38  ;;  %v2380_v38 = vld [vmem:[%s3120_s2 + $0x214] ss:$8 sps:$4 sm:$0xff]  }
  0x76   : > { %1131 = vmatprep.subr.bf16.mxu0 %v2365_v41  ;;  %v741_v41 = vadd.s32 4294967295, %v736_v27 }
  0x78   : > { %vm751_vm6 = vcmp.lt.s32.totalorder %v741_v41, 32 }
  0x79   : > { %1132 = vmatpush1.bf16.msra.mxu0 %v2363_v42 }
  0x7a   : > { %1133 = vmatprep.subr.bf16.mxu0 %v2371_v45 }
  0x7d   : > { %1134 = vmatpush1.bf16.msra.mxu0 %v2369_v46 }
  0x7e   : > { %1135 = vmatprep.subr.bf16.mxu0 %v2377_v48  ;;  %v2378_v48 = vld [vmem:[%s3120_s2 + $0x210] ss:$8 sps:$4 sm:$0xff]  }
  0x81   : > { %1136 = vmatpush1.bf16.msra.mxu0 %v2375_v49  ;;  %v2386_v49 = vld [vmem:[%s3120_s2 + $0x224] ss:$8 sps:$4 sm:$0xff]  }
  0x82   : > { %1137 = vmatprep.subr.bf16.mxu0 %v2383_v50 }
  0x85   : > { %1138 = vmatpush1.bf16.msra.mxu0 %v2381_v51 }
  0x86   : > { %1139 = vmatprep.subr.bf16.mxu0 %v2389_v52 }
  0x89   : > { %1140 = vmatpush1.bf16.msra.mxu0 %v2387_v53 }
  0x8a   : > { %1730 = vmatprep.subr.bf16.mxu0 %v2856_v54 }
  0xff   : > { %v442_v55 = vpop.f32.mrb[8].mxu0 }
 0x100   : > { %v444_v56 = vpop.f32.mrb[9].mxu0 }
 0x101   : > { %v446_v57 = vpop.f32.mrb[10].mxu0 }
 0x102   : > { %v447_v58 = vpop.f32.mrb[11].mxu0 }
 0x117   : > { %v553_v61 = vpop.f32.mrb[12].mxu0 }
 0x118   : > { %v2861_v62 = vadd.f32 %v553_v61, %v442_v55  ;;  %v555_v63 = vpop.f32.mrb[13].mxu0 }
 0x119   : > { %v2864_v1 = vadd.f32 %v555_v63, %v444_v56  ;;  %v557_v3 = vpop.f32.mrb[14].mxu0 }
 0x11a   : > { %v558_v6 = vpop.f32.mrb[15].mxu0  ;;  %v2384_v3 = vld [vmem:[%s3120_s2 + $0x220] ss:$8 sps:$4 sm:$0xff]  }
 0x11f   : > { %v662_v10 = vpop.f32.mrb[0].mxu0 }
 0x120   : > { %v711_v11 = vadd.f32 %v2872_v7, %v662_v10  ;;  %v664_v12 = vpop.f32.mrb[1].mxu0 }
 0x121   : > { %v712_v13 = vadd.f32 %v2877_v9, %v664_v12  ;;  %v666_v14 = vpop.f32.mrb[2].mxu0 }
 0x122   : > { %v721_v15 = vmax.f32 %v711_v11, 0.0  ;;  %v713_v16 = vadd.f32 %v2872_v7, %v666_v14  ;;  %v668_v17 = vpop.f32.mrb[3].mxu0 }
 0x123   : > { %v722_v18 = vmax.f32 %v712_v13, 0.0  ;;  %v714_v19 = vadd.f32 %v2877_v9, %v668_v17 }
 0x124   : > { %v767_v20 = vsel %vm742_vm3, %v721_v15, 0.0  ;;  %v723_v21 = vmax.f32 %v713_v16, 0.0 }
 0x125   : > { %v768_v22 = vsel %vm742_vm3, %v722_v18, 0.0  ;;  %v724_v23 = vmax.f32 %v714_v19, 0.0 }
 0x126   : > { %v2165_v24 = vpack.c.bf16 %v768_v22, %v767_v20  ;;  %v2447_v34 = vpack.c.bf16 %v723_v21, %v767_v20  ;;  %v2452_v46 = vpack.c.bf16 %v723_v21, %v721_v15 }
 0x127   : > { %v2166_v25 = vpack.c.bf16 %v724_v23, %v723_v21  ;;  %v672_v26 = vpop.f32.mrb[4].mxu0  ;;  %v2446_v32 = vpack.c.bf16 %v724_v23, %v768_v22  ;;  %v2449_v43 = vpack.c.bf16 %v724_v23, %v722_v18  ;;  %v2390_v21 = vld [vmem:[%s3120_s2 + $0x230] ss:$8 sps:$4 sm:$0xff]  }
 0x128   : > { %809 = vst [vmem:[#allocation2] sm:$0xff] %v2165_v24  ;;  %v715_v28 = vadd.f32 %v2872_v7, %v672_v26  ;;  %v674_v29 = vpop.f32.mrb[5].mxu0  ;;  %v908_v45 = vshll.u32 %v2447_v34, 16  ;;  %v906_v61 = vshrl.u32 %v2447_v34, 16  ;;  %v2936_v26 = vld [vmem:[%s3121_s3] ss:$8 sps:$4 sm:$0xff]  }
 0x129   : > { %v716_v30 = vadd.f32 %v2877_v9, %v674_v29  ;;  %v676_v31 = vpop.f32.mrb[6].mxu0  ;;  %v920_v42 = vshll.u32 %v2446_v32, 16  ;;  %2450 = vmatprep.mubr.msk.bf16.mxu1 %vm2448_vm5, %v2449_v43  ;;  %v918_v11 = vshrl.u32 %v2446_v32, 16  ;;  %v2398_v34 = vld [vmem:[%s3120_s2 + $0x254] ss:$8 sps:$4 sm:$0xff]  }
 0x12a   : > { %v725_v35 = vmax.f32 %v715_v28, 0.0  ;;  %v717_v36 = vadd.f32 %v2872_v7, %v676_v31  ;;  %v678_v37 = vpop.f32.mrb[7].mxu0  ;;  %2453 = vmatmul.mubr.msk.bf16.vlgmr.msra.gmra.mrb[0].mxu1 %vm2448_vm5, %v2452_v46  ;;  %v910_v56 = vrot.slane %v908_v45, 1  ;;  %v2949_v31 = vld [vmem:[%s3121_s3 + $0x14] ss:$8 sps:$4 sm:$0xff]  }
 0x12b   : > { %v726_v39 = vmax.f32 %v716_v30, 0.0  ;;  %v718_v40 = vadd.f32 %v2877_v9, %v678_v37  ;;  %1593 = vmatpush1.bf16.msra.mxu1 %v2372_v33  ;;  %v922_v52 = vrot.slane %v920_v42, 1  ;;  %v2393_v33 = vld [vmem:[%s3120_s2 + $0x240] ss:$8 sps:$4 sm:$0xff]   ;;  %v2396_v37 = vld [vmem:[%s3120_s2 + $0x250] ss:$8 sps:$4 sm:$0xff]  }
 0x12c   : > { %v727_v44 = vmax.f32 %v717_v36, 0.0  ;;  %1594 = vmatprep.subr.bf16.mxu1 %v2380_v38  ;;  %v911_v18 = vor.u32 %v910_v56, %v906_v61  ;;  %v2967_v36 = vld [vmem:[%s3121_s3 + $0x24] ss:$8 sps:$4 sm:$0xff]   ;;  %v2401_v42 = vld [vmem:[%s3120_s2 + $0x260] ss:$8 sps:$4 sm:$0xff]  }
 0x12d   : > { %v728_v47 = vmax.f32 %v718_v40, 0.0  ;;  %v923_v17 = vor.u32 %v922_v52, %v918_v11  ;;  %v2403_v38 = vld [vmem:[%s3120_s2 + $0x264] ss:$8 sps:$4 sm:$0xff]   ;;  %v2985_v40 = vld [vmem:[%s3121_s3 + $0x34] ss:$8 sps:$4 sm:$0xff]  }
 0x12e   : > { %v2910_v4 = vpack.c.bf16 %v727_v44, %v725_v35  ;;  %v2961_v35 = vld [vmem:[%s3121_s3 + $0x10] ss:$8 sps:$4 sm:$0xff]   ;;  %v2406_v45 = vld [vmem:[%s3120_s2 + $0x274] ss:$8 sps:$4 sm:$0xff]   ;;  %v2415_v11 = vld [vmem:[%s3120_s2 + $0x2a4] ss:$8 sps:$4 sm:$0xff]  }
 0x12f   : > { %v682_v50 = vpop.f32.mrb[16].mxu0  ;;  %v1379_v51 = vld [vmem:[#allocation2] sm:$0xee]  ;;  %1595 = vmatpush1.bf16.msra.mxu1 %v2378_v48  ;;  %v2905_v63 = vpack.c.bf16 %v728_v47, %v726_v39  ;;  %v3001_v46 = vld [vmem:[%s3121_s3 + $0x30] ss:$8 sps:$4 sm:$0xff]  }
 0x130   : > { %v697_v53 = vadd.f32 %v682_v50, %v2861_v62  ;;  %v684_v55 = vpop.f32.mrb[17].mxu0  ;;  %v2115_v57 = vcombine.low %v1379_v51, %v2166_v25  ;;  %v2116_v58 = vcombine.high %v1379_v51, %v2166_v25  ;;  %1596 = vmatprep.subr.bf16.mxu1 %v2386_v49  ;;  %v913_v16 = vshll.u32 %v2910_v4, 16  ;;  %v2395_v25 = vld [vmem:[%s3120_s2 + $0x244] ss:$8 sps:$4 sm:$0xff]   ;;  %v2979_v39 = vld [vmem:[%s3121_s3 + $0x20] ss:$8 sps:$4 sm:$0xff]  }
 0x131   : > { %v698_v59 = vadd.f32 %v684_v55, %v2864_v1  ;;  %v686_v6 = vpop.f32.mrb[18].mxu0  ;;  %v2392_v1 = vld [vmem:[%s3120_s2 + $0x234] ss:$8 sps:$4 sm:$0xff]   ;;  %1368 = vmatprep.mubr.bf16.mxu1 %v2905_v63  ;;  %v1422_v14 = vrot.slane %v2905_v63, 1  ;;  %v925_v15 = vshll.u32 %v2905_v63, 16  ;;  %v1419_v19 = vrot.slane %v2910_v4, 1 }
 0x132   : > { %v719_v8 = vadd.f32 %v2872_v7, %v697_v53  ;;  %v1418_v62 = vrot.slane %v2115_v57, 1  ;;  %v1421_v10 = vrot.slane %v2116_v58, 1  ;;  %v687_v12 = vpop.f32.mrb[19].mxu0  ;;  %1369 = vmatmul.mubr.bf16.gmra.mrb[4].mxu1 %v2910_v4  ;;  %v915_v23 = vrot.slane %v913_v16, 1  ;;  %v2404_v51 = vld [vmem:[%s3120_s2 + $0x270] ss:$8 sps:$4 sm:$0xff]  }
 0x133   : > { %v720_v13 = vadd.f32 %v2877_v9, %v698_v59  ;;  %1597 = vmatpush1.bf16.msra.mxu1 %v2384_v3  ;;  %v927_v22 = vrot.slane %v925_v15, 1  ;;  %v937_v47 = vshrl.u32 %v2905_v63, 16  ;;  %v929_v49 = vshrl.u32 %v2910_v4, 16  ;;  %v2409_v57 = vld [vmem:[%s3120_s2 + $0x284] ss:$8 sps:$4 sm:$0xff]  }
 0x134   : > { %v729_v7 = vmax.f32 %v719_v8, 0.0  ;;  %v1423_v9 = vsel %vm573_vm2, %v1421_v10, %v1422_v14  ;;  %1598 = vmatprep.subr.bf16.mxu1 %v2392_v1  ;;  %v2941_v27 = vsel %vm573_vm2, %v1418_v62, %v1419_v19  ;;  %v916_v30 = vsel %vm314_vm0, %v911_v18, %v915_v23  ;;  %v2443_v58 = vld [vmem:[%s2563_s18] sm:$0xfe]   ;;  %v2444_v59 = vld [vmem:[%s2563_s18 + $0x8] sm:$0xff]   ;;  %v2412_v8 = vld [vmem:[%s3120_s2 + $0x294] ss:$8 sps:$4 sm:$0xff]  }
 0x135   : > { %v730_v20 = vmax.f32 %v720_v13, 0.0  ;;  %1624 = vmatprep.mubr.bf16.mxu1 %v1423_v9  ;;  %v928_v29 = vsel %vm314_vm0, %v923_v17, %v927_v22  ;;  %v939_v52 = vor.u32 %v937_v47, %v927_v22  ;;  %v931_v55 = vor.u32 %v929_v49, %v915_v23  ;;  %v2407_v6 = vld [vmem:[%s3120_s2 + $0x280] ss:$8 sps:$4 sm:$0xff]   ;;  %v2410_v1 = vld [vmem:[%s3120_s2 + $0x290] ss:$8 sps:$4 sm:$0xff]  }
 0x136   : > { %v775_v24 = vsel %vm751_vm6, %v729_v7, 0.0  ;;  %1141 = vmatprep.mubr.bf16.mxu0 %v928_v29  ;;  %v1679_v62 = vrot.slane %v2443_v58, 1  ;;  %v1680_v10 = vrot.slane %v2444_v59, 1  ;;  %v2413_v13 = vld [vmem:[%s3120_s2 + $0x2a0] ss:$8 sps:$4 sm:$0xff]  }
 0x137   : > { %v776_v28 = vsel %vm751_vm6, %v730_v20, 0.0  ;;  %1599 = vmatpush1.bf16.msra.mxu1 %v2390_v21  ;;  %1142 = vmatmul.mubr.bf16.vlgmr.msra.gmra.mrb[20].mxu0 %v916_v30  ;;  %v2418_v15 = vld [vmem:[%s3120_s2 + $0x2b4] ss:$8 sps:$4 sm:$0xff]   ;;  %v2416_v16 = vld [vmem:[%s3120_s2 + $0x2b0] ss:$8 sps:$4 sm:$0xff]  }
 0x138   : > { %v2169_v32 = vpack.c.bf16 %v776_v28, %v775_v24  ;;  %1600 = vmatprep.subr.bf16.mxu1 %v2395_v25  ;;  %1731 = vmatpush1.bf16.msra.mxu0 %v2936_v26  ;;  %v1681_v12 = vsel %vm573_vm2, %v1679_v62, %v1680_v10  ;;  %v2421_v7 = vld [vmem:[%s3120_s2 + $0x2c4] ss:$8 sps:$4 sm:$0xff]   ;;  %v2419_v17 = vld [vmem:[%s3120_s2 + $0x2c0] ss:$8 sps:$4 sm:$0xff]   ;;  %v2427_v18 = vld [vmem:[%s3120_s2 + $0x2d4] ss:$8 sps:$4 sm:$0xff]  }
 0x139   : > { %1732 = vmatprep.subr.bf16.mxu0 %v2949_v31  ;;  %v2425_v20 = vld [vmem:[%s3120_s2 + $0x2d0] ss:$8 sps:$4 sm:$0xff]   ;;  %v2433_v9 = vld [vmem:[%s3120_s2 + $0x2e4] ss:$8 sps:$4 sm:$0xff]   ;;  %v2431_v21 = vld [vmem:[%s3120_s2 + $0x2e0] ss:$8 sps:$4 sm:$0xff]  }
 0x13a   : > { %813 = vst [vmem:[#allocation2 + $0x20] sm:$0x11] %v2169_v32  ;;  %v2439_v22 = vld [vmem:[%s3120_s2 + $0x2f4] ss:$8 sps:$4 sm:$0xff]   ;;  %v2437_v23 = vld [vmem:[%s3120_s2 + $0x2f0] ss:$8 sps:$4 sm:$0xff]  }
 0x13b   : > { %1601 = vmatpush1.bf16.msra.mxu1 %v2393_v33  ;;  %v2445_v63 = vld [vmem:[%s2563_s18 + $0x10] ss:$0 sps:$4 sm:$0x11]  }
 0x13c   : > { %1602 = vmatprep.subr.bf16.mxu1 %v2398_v34  ;;  %1733 = vmatpush1.bf16.msra.mxu0 %v2961_v35 }
 0x13d   : > { %1734 = vmatprep.subr.bf16.mxu0 %v2967_v36 }
 0x13f   : > { %1603 = vmatpush1.bf16.msra.mxu1 %v2396_v37  ;;  %v1791_v37 = vld [vmem:[%s3123_s5] sm:$0x3] }
 0x140   : > { %1604 = vmatprep.subr.bf16.mxu1 %v2403_v38  ;;  %1735 = vmatpush1.bf16.msra.mxu0 %v2979_v39 }
 0x141   : > { %v850_v41 = vld [vmem:[#allocation2 + $0x20] sm:$0x11]  ;;  %1736 = vmatprep.subr.bf16.mxu0 %v2985_v40 }
 0x142   : > { %v2990_v43 = vcombine.high %v850_v41, %v850_v41  ;;  %v2992_v44 = vcombine.low %v850_v41, %v850_v41  ;;  %v1796_v41 = vrot.slane %v1791_v37, %v703_v0 }
 0x143   : > { %1605 = vmatpush1.bf16.msra.mxu1 %v2401_v42 }
 0x144   : > { %v941_v48 = vshll.u32 %v2990_v43, 16  ;;  %v933_v50 = vshll.u32 %v2992_v44, 16  ;;  %1606 = vmatprep.subr.bf16.mxu1 %v2406_v45  ;;  %1737 = vmatpush1.bf16.msra.mxu0 %v3001_v46  ;;  %v1426_v24 = vrot.slane %v2990_v43, 1  ;;  %v1424_v28 = vrot.slane %v2992_v44, 1 }
 0x145   : > { %v1800_v44 = vrot.slane %v1791_v37, %v707_v5 }
 0x146   : > { %v943_v53 = vrot.slane %v941_v48, 1  ;;  %v935_v56 = vrot.slane %v933_v50, 1  ;;  %v1427_v25 = vsel %vm573_vm2, %v1422_v14, %v1426_v24  ;;  %v1682_v14 = vrot.slane %v2445_v63, 1 }
 0x147   : > { %1607 = vmatpush1.bf16.msra.mxu1 %v2404_v51 }
 0x148   : > { %v944_v61 = vsel %vm314_vm0, %v939_v52, %v943_v53  ;;  %v936_v3 = vsel %vm314_vm0, %v931_v55, %v935_v56  ;;  %1608 = vmatprep.subr.bf16.mxu1 %v2409_v57 }
 0x149   : > { %1151 = vmatprep.mubr.bf16.mxu0 %v944_v61 }
 0x14a   : > { %1152 = vmatmul.mubr.bf16.gmra.mrb[24].mxu0 %v936_v3 }
 0x14b   : > { %1762 = vmatprep.mubr.bf16.mxu0 %v2480_v2  ;;  %1609 = vmatpush1.bf16.msra.mxu1 %v2407_v6 }
 0x14c   : > { %1610 = vmatprep.subr.bf16.mxu1 %v2412_v8 }
 0x14f   : > { %1611 = vmatpush1.bf16.msra.mxu1 %v2410_v1 }
 0x150   : > { %1612 = vmatprep.subr.bf16.mxu1 %v2415_v11 }
 0x152   : > { %2160 = vmatmul.mubr.msk.bf16.vlgmr.msra.gmra.mrb[28].mxu0 %vm378_vm1, %v1681_v12 }
 0x153   : > { %1613 = vmatpush1.bf16.msra.mxu1 %v2413_v13 }
 0x154   : > { %1614 = vmatprep.subr.bf16.mxu1 %v2418_v15 }
 0x157   : > { %1615 = vmatpush1.bf16.msra.mxu1 %v2416_v16 }
 0x158   : > { %1616 = vmatprep.subr.bf16.mxu1 %v2421_v7 }
 0x15b   : > { %1617 = vmatpush1.bf16.msra.mxu1 %v2419_v17 }
 0x15c   : > { %1618 = vmatprep.subr.bf16.mxu1 %v2427_v18 }
 0x15f   : > { %1619 = vmatpush1.bf16.msra.mxu1 %v2425_v20 }
 0x160   : > { %1620 = vmatprep.subr.bf16.mxu1 %v2433_v9 }
 0x163   : > { %1621 = vmatpush1.bf16.msra.mxu1 %v2431_v21 }
 0x164   : > { %1622 = vmatprep.subr.bf16.mxu1 %v2439_v22 }
 0x167   : > { %1623 = vmatpush1.bf16.msra.mxu1 %v2437_v23 }
 0x168   : > { %2170 = vmatprep.subr.bf16.mxu1 %v2856_v54  ;;  %v1425_v54 = vsel %vm573_vm2, %v1419_v19, %v1424_v28 }
 0x16a   : > { %1625 = vmatmul.mubr.bf16.vlgmr.msra.gmra.mrb[0].mxu1 %v2941_v27 }
 0x16b   : > { %1634 = vmatprep.mubr.bf16.mxu1 %v1427_v25  ;;  %2174 = vmatpush1.bf16.msra.mxu1 %v2936_v26  ;;  %v1683_v26 = vsel %vm573_vm2, %v1680_v10, %v1682_v14 }
 0x16c   : > { %2171 = vmatprep.subr.bf16.mxu1 %v2949_v31 }
 0x16f   : > { %2175 = vmatpush1.bf16.msra.mxu1 %v2961_v35 }
 0x170   : > { %2172 = vmatprep.subr.bf16.mxu1 %v2967_v36 }
 0x172   : > { %1635 = vmatmul.mubr.bf16.gmra.mrb[4].mxu1 %v1425_v54 }
 0x173   : > { %2176 = vmatpush1.bf16.msra.mxu1 %v2979_v39  ;;  %1772 = vmatprep.mubr.bf16.mxu1 %v2480_v2 }
 0x174   : > { %2173 = vmatprep.subr.bf16.mxu1 %v2985_v40 }
 0x177   : > { %2177 = vmatpush1.bf16.msra.mxu1 %v3001_v46 }
 0x17e   : > { %2161 = vmatmul.mubr.msk.bf16.vlgmr.msra.gmra.mrb[4].mxu1 %vm378_vm1, %v1683_v26 }
 0x20a   : > { %v1143_v27 = vpop.f32.mrb[20].mxu0 }
 0x20b   : > { %v1145_v29 = vpop.f32.mrb[21].mxu0 }
 0x20c   : > { %v1147_v4 = vpop.f32.mrb[22].mxu0 }
 0x20d   : > { %v1149_v30 = vpop.f32.mrb[23].mxu0 }
 0x21d   : > { %v1153_v19 = vpop.f32.mrb[24].mxu0 }
 0x21e   : > { %v1155_v31 = vpop.f32.mrb[25].mxu0 }
 0x21f   : > { %v1157_v32 = vpop.f32.mrb[26].mxu0 }
 0x220   : > { %v1159_v33 = vpop.f32.mrb[27].mxu0 }
 0x225   : > { %v1764_v2 = vpop.f32.mrb[28].mxu0 }
 0x226   : > { %v1766_v34 = vpop.f32.mrb[29].mxu0 }
 0x227   : > { %v1768_v35 = vpop.f32.mrb[30].mxu0 }
 0x228   : > { %v1770_v36 = vpop.f32.mrb[31].mxu0 }
 0x23d   : > { %v1626_v38 = vpop.f32.mrb[0].mxu1 }
 0x23e   : > { %v2178_v39 = vadd.f32 %v1626_v38, %v1143_v27  ;;  %v1628_v40 = vpop.f32.mrb[1].mxu1 }
 0x23f   : > { %v2180_v42 = vadd.f32 %v1628_v40, %v1145_v29  ;;  %v1630_v43 = vpop.f32.mrb[2].mxu1 }
 0x240   : > { %v2182_v45 = vadd.f32 %v1630_v43, %v1147_v4  ;;  %v2179_v46 = vadd.f32 %v2178_v39, %v1764_v2  ;;  %v1632_v47 = vpop.f32.mrb[3].mxu1 }
 0x241   : > { %v2184_v48 = vadd.f32 %v1632_v47, %v1149_v30  ;;  %v2181_v49 = vadd.f32 %v2180_v42, %v1766_v34 }
 0x242   : > { %v1803_v50 = vadd.f32 %v2179_v46, %v1796_v41  ;;  %v2183_v51 = vadd.f32 %v2182_v45, %v1768_v35 }
 0x243   : > { %v1804_v0 = vadd.f32 %v2181_v49, %v1800_v44  ;;  %v2185_v60 = vadd.f32 %v2184_v48, %v1770_v36 }
 0x244   : > { %v1811_v5 = vmax.f32 %v1803_v50, 0.0  ;;  %v1805_v52 = vadd.f32 %v2183_v51, %v1796_v41 }
 0x245   : > { %v1812_v53 = vmax.f32 %v1804_v0, 0.0  ;;  %v1806_v55 = vadd.f32 %v2185_v60, %v1800_v44 }
 0x246   : > { %1819 = vst [vmem:[%s3099_s20] sm:$0xff] %v1811_v5  ;;  %v1813_v56 = vmax.f32 %v1805_v52, 0.0 }
 0x247   : > { %1820 = vst [vmem:[%s3099_s20 + $0x8] sm:$0xff] %v1812_v53  ;;  %v1814_v57 = vmax.f32 %v1806_v55, 0.0 }
 0x248   : > { %1821 = vst [vmem:[%s3099_s20 + $0x10] sm:$0xff] %v1813_v56 }
 0x249   : > { %1822 = vst [vmem:[%s3099_s20 + $0x18] sm:$0xff] %v1814_v57 }
 0x251   : > { %v1774_v58 = vpop.f32.mrb[4].mxu1 }
 0x252   : > { %v2186_v59 = vadd.f32 %v1774_v58, %v1153_v19  ;;  %v1776_v61 = vpop.f32.mrb[5].mxu1 }
 0x253   : > { %v2187_v3 = vadd.f32 %v1776_v61, %v1155_v31  ;;  %v1778_v6 = vpop.f32.mrb[6].mxu1 }
 0x254   : > { %v1807_v8 = vadd.f32 %v2186_v59, %v1796_v41  ;;  %v2188_v62 = vadd.f32 %v1778_v6, %v1157_v32  ;;  %v1780_v10 = vpop.f32.mrb[7].mxu1 }
 0x255   : > { %v1808_v1 = vadd.f32 %v2187_v3, %v1800_v44  ;;  %v2189_v11 = vadd.f32 %v1780_v10, %v1159_v33 }
 0x256   : > { %v1815_v12 = vmax.f32 %v1807_v8, 0.0  ;;  %v1809_v13 = vadd.f32 %v2188_v62, %v1796_v41 }
 0x257   : > { %v1816_v15 = vmax.f32 %v1808_v1, 0.0  ;;  %v1810_v16 = vadd.f32 %v2189_v11, %v1800_v44 }
 0x258   : > { %1823 = vst [vmem:[%s3099_s20 + $0x20] sm:$0xff] %v1815_v12  ;;  %v1817_v7 = vmax.f32 %v1809_v13, 0.0 }
 0x259   : > { %1824 = vst [vmem:[%s3099_s20 + $0x28] sm:$0xff] %v1816_v15  ;;  %v1818_v17 = vmax.f32 %v1810_v16, 0.0 }
 0x25a   : > { %1825 = vst [vmem:[%s3099_s20 + $0x30] sm:$0xff] %v1817_v7 }
 0x25b   : > { %1826 = vst [vmem:[%s3099_s20 + $0x38] sm:$0xff] %v1818_v17 }
 0x25c PF: > { %s16_s23 = sadd.s32 1, %s2478_s23   ;;  %s3125_s21 = smov %s2474_s22 }
 0x25d   : > { %p13_p5 = scmp.ge.s32.totalorder %s16_s23, 4   ;;  %s3126_s22 = smov %s3128_s24 }
 0x25f   :  { %15 = sbr.rel (!%p13_p5) target bundleno = 2 (0x2), region = 78 }

</bundles_post_ra>
